<compile_context>
chip_gen: v5e
topology: v5e:2x2
jax: 0.10.0
libtpu: 0.0.40
codegen_flags: <defaults>
</compile_context>

<pallas_src>
import functools

import jax
import jax.numpy as jnp
from jax.experimental import pallas as pl
from jax.experimental.pallas import tpu as pltpu


def _round_up(x, m):
    return (-(-x // m)) * m


def _default_vmem_limit_bytes():
    """Generation-aware scoped VMEM limit: generous on 128-MiB parts, safe on 64-MiB v7x."""
    phys = 64 << 20  # conservative fallback
    try:
        info = pltpu.get_tpu_info()
        phys = int(getattr(info, "vmem_capacity_bytes", phys))
    except Exception:
        pass
    if phys >= (128 << 20):
        return 96 << 20
    return 40 << 20


def _kl_block_kernel(stu_ref, tea_ref, part_ref, *, inv_temperature, block_rows, n_rows,
                     mask_needed):
    """Per-block KL(teacher || student) terms, folded to an (8, C) lane-dense partial."""
    s = stu_ref[...].astype(jnp.float32)
    t = tea_ref[...].astype(jnp.float32)
    c = s.shape[1]

    if mask_needed:
        # Ragged last block: rows past N contain unspecified data. Force them to s = t = 0
        # (identical distributions) so their KL term is exactly 0 and no NaN/Inf can leak
        # through exp. Only emitted when N % block_rows != 0.
        row_start = pl.program_id(0) * block_rows
        row_ids = jax.lax.broadcasted_iota(jnp.int32, (block_rows, c), 0)
        valid = row_ids < (n_rows - row_start)
        s = jnp.where(valid, s, 0.0)
        t = jnp.where(valid, t, 0.0)

    # One shared per-row max for both log-softmaxes (shift-invariant; invT > 0 commutes
    # with max) -> a single XLU lane max-reduce instead of two.
    m = jnp.max(jnp.maximum(s, t), axis=1, keepdims=True) * inv_temperature

    s_shift = s * inv_temperature - m
    t_shift = t * inv_temperature - m
    s_z = jnp.sum(jnp.exp(s_shift), axis=1, keepdims=True)
    t_exp = jnp.exp(t_shift)
    t_z = jnp.sum(t_exp, axis=1, keepdims=True)

    # p_t via fast EUP reciprocal (~1e-4 rel err, washes out in the batchmean reduction).
    p_t = t_exp * pl.reciprocal(t_z, approx=True)

    # Fused KL term: p_t * (log p_t - log p_s)
    #   = p_t * ((t_shift - s_shift) + (log s_z - log t_z))
    rowconst = jnp.log(s_z) - jnp.log(t_z)
    kl = p_t * ((t_shift - s_shift) + rowconst)          # (block_rows, C) f32

    # Fold sublane groups of 8 with elementwise VPU adds (layout-free reshape along the
    # leading dim of existing (8, 128) tiles); no XLU cross-lane reduce in the kernel.
    folded = jnp.sum(kl.reshape(block_rows // 8, 8, c), axis=0)  # (8, C)
    part_ref[0, :, :] = folded


def kl_divergence_loss(stu_outputs, tea_outputs, temperature=1.2, block_rows=None,
                       vmem_limit_bytes=None):
    """Pallas equivalent of KLDivergenceLoss.forward. Inputs: (N, C) logits. Returns scalar f32."""
    assert stu_outputs.shape == tea_outputs.shape and stu_outputs.ndim == 2
    n, c = stu_outputs.shape

    if vmem_limit_bytes is None:
        vmem_limit_bytes = _default_vmem_limit_bytes()

    in_itemsize = max(jnp.dtype(stu_outputs.dtype).itemsize,
                      jnp.dtype(tea_outputs.dtype).itemsize)
    # Sublane packing: f32 -> 8 rows/vreg, bf16 -> 16, int8/fp8 -> 32.
    row_align = 8 if in_itemsize >= 4 else (16 if in_itemsize == 2 else 32)
    n_rounded = _round_up(n, row_align)

    if block_rows is None:
        # VMEM budget: 2 inputs x 2 pipeline buffers of (block, C) input dtype, plus ~6 live
        # f32 (block, C) temporaries in the body. Stay at half the scoped limit so
        # double-buffering and compiler scratch survive on v7x's 64 MiB physical VMEM.
        bytes_per_row = c * (4 * in_itemsize + 6 * 4)
        block_rows = min(1024, (vmem_limit_bytes // 2) // max(bytes_per_row, 1))
    block_rows = int(block_rows)
    block_rows -= block_rows % row_align
    block_rows = max(row_align, block_rows)

    # Pipelining / megacore: prefer >= ~4 grid steps when N permits (overlap DMA with
    # compute; lets v7x shard the 'parallel' axis across both TensorCores).
    pipeline_cap = _round_up(-(-n_rounded // 4), row_align)
    block_rows = max(row_align, min(block_rows, pipeline_cap, n_rounded))
    # TODO(synk): for very large C (LLM-vocab scale), tile over C with an online
    # log-sum-exp pass instead of loading full rows; current version assumes a
    # (block_rows, C) row slab fits in the VMEM budget.

    num_blocks = -(-n // block_rows)
    mask_needed = (n % block_rows) != 0   # static: masking code only emitted if ragged

    kernel = functools.partial(
        _kl_block_kernel,
        inv_temperature=1.0 / float(temperature),
        block_rows=block_rows,
        n_rows=n,
        mask_needed=mask_needed,
    )

    partials = pl.pallas_call(
        kernel,
        out_shape=jax.ShapeDtypeStruct((num_blocks, 8, c), jnp.float32),
        grid_spec=pltpu.PrefetchScalarGridSpec(
            num_scalar_prefetch=0,
            grid=(num_blocks,),
            in_specs=[
                pl.BlockSpec((block_rows, c), lambda i: (i, 0)),
                pl.BlockSpec((block_rows, c), lambda i: (i, 0)),
            ],
            out_specs=pl.BlockSpec((1, 8, c), lambda i: (i, 0, 0)),
        ),
        compiler_params=pltpu.CompilerParams(
            dimension_semantics=("parallel",),     # independent blocks -> megacore-friendly
            vmem_limit_bytes=int(vmem_limit_bytes),
        ),
    )(stu_outputs, tea_outputs)

    # Tiny final reduction (num_blocks * 8 * C f32) and batchmean normalization in XLA.
    return jnp.sum(partials) / jnp.float32(n)


def _reference(stu, tea, temperature=1.2):
    s = stu.astype(jnp.float32) / temperature
    t = tea.astype(jnp.float32) / temperature
    log_p_s = jax.nn.log_softmax(s, axis=1)
    p_t = jax.nn.softmax(t, axis=1)
    log_p_t = jax.nn.log_softmax(t, axis=1)
    return jnp.sum(p_t * (log_p_t - log_p_s)) / stu.shape[0]


if __name__ == "__main__":
    key = jax.random.PRNGKey(0)
    k1, k2 = jax.random.split(key)
    N, C = 16, 128  # small, (8,128)-tile friendly
    stu = jax.random.normal(k1, (N, C), dtype=jnp.float32) * 2.0
    tea = jax.random.normal(k2, (N, C), dtype=jnp.float32) * 2.0

    loss = jax.block_until_ready(kl_divergence_loss(stu, tea, temperature=1.2))
    ref = jax.block_until_ready(_reference(stu, tea, temperature=1.2))
    assert jnp.allclose(loss, ref, rtol=2e-3, atol=1e-5), (loss, ref)

    # Exercise the ragged-N (in-kernel masking, no padding copy) path.
    loss_odd = jax.block_until_ready(kl_divergence_loss(stu[:13], tea[:13], temperature=1.2))
    ref_odd = jax.block_until_ready(_reference(stu[:13], tea[:13], temperature=1.2))
    assert jnp.allclose(loss_odd, ref_odd, rtol=2e-3, atol=1e-5), (loss_odd, ref_odd)

    print("KERNEL_OK")
</pallas_src>

<mosaic_0001>
module attributes {stable_mosaic.version = 11 : i64} {
  func.func @_kl_block_kernel(%arg0: i32, %arg1: memref<8x128xf32, #tpu.memory_space<vmem>>, %arg2: memref<8x128xf32, #tpu.memory_space<vmem>>, %arg3: memref<1x8x128xf32, #tpu.memory_space<vmem>>) attributes {dimension_semantics = [#tpu.dimension_semantics<parallel>], iteration_bounds = array<i64: 2>, scalar_prefetch = 0 : i64, scratch_operands = 0 : i64, tpu.core_type = #tpu.core_type<tc>, window_params = [{transform_indices = @transform_0, window_bounds = array<i64: 8, 128>}, {transform_indices = @transform_1, window_bounds = array<i64: 8, 128>}, {transform_indices = @transform_2, window_bounds = array<i64: 1, 8, 128>}]} {
    %c0 = arith.constant 0 : index
    %c0_0 = arith.constant 0 : index
    %0 = vector.load %arg1[%c0, %c0_0] : memref<8x128xf32, #tpu.memory_space<vmem>>, vector<8x128xf32>
    %c0_1 = arith.constant 0 : index
    %c0_2 = arith.constant 0 : index
    %1 = vector.load %arg2[%c0_1, %c0_2] : memref<8x128xf32, #tpu.memory_space<vmem>>, vector<8x128xf32>
    %2 = arith.maximumf %0, %1 : vector<8x128xf32>
    %cst = arith.constant dense<0xFF800000> : vector<8xf32>
    %3 = vector.multi_reduction <maximumf>, %2, %cst [1] : vector<8x128xf32> to vector<8xf32>
    %4 = vector.shape_cast %3 : vector<8xf32> to vector<8x1xf32>
    %cst_3 = arith.constant 0.833333313 : f32
    %5 = vector.broadcast %cst_3 : f32 to vector<8x1xf32>
    %6 = arith.mulf %4, %5 : vector<8x1xf32>
    %cst_4 = arith.constant 0.833333313 : f32
    %7 = vector.broadcast %cst_4 : f32 to vector<8x128xf32>
    %8 = arith.mulf %0, %7 : vector<8x128xf32>
    %9 = vector.broadcast %6 : vector<8x1xf32> to vector<8x128xf32>
    %10 = arith.subf %8, %9 : vector<8x128xf32>
    %cst_5 = arith.constant 0.833333313 : f32
    %11 = vector.broadcast %cst_5 : f32 to vector<8x128xf32>
    %12 = arith.mulf %1, %11 : vector<8x128xf32>
    %13 = vector.broadcast %6 : vector<8x1xf32> to vector<8x128xf32>
    %14 = arith.subf %12, %13 : vector<8x128xf32>
    %15 = math.exp %10 : vector<8x128xf32>
    %cst_6 = arith.constant dense<0.000000e+00> : vector<8xf32>
    %16 = vector.multi_reduction <add>, %15, %cst_6 [1] : vector<8x128xf32> to vector<8xf32>
    %17 = vector.shape_cast %16 : vector<8xf32> to vector<8x1xf32>
    %18 = math.exp %14 : vector<8x128xf32>
    %cst_7 = arith.constant dense<0.000000e+00> : vector<8xf32>
    %19 = vector.multi_reduction <add>, %18, %cst_7 [1] : vector<8x128xf32> to vector<8xf32>
    %20 = vector.shape_cast %19 : vector<8xf32> to vector<8x1xf32>
    %21 = tpu.reciprocal %20 {approx = true} : vector<8x1xf32> -> vector<8x1xf32>
    %22 = vector.broadcast %21 : vector<8x1xf32> to vector<8x128xf32>
    %23 = arith.mulf %18, %22 : vector<8x128xf32>
    %24 = math.log %17 : vector<8x1xf32>
    %25 = math.log %20 : vector<8x1xf32>
    %26 = arith.subf %24, %25 : vector<8x1xf32>
    %27 = arith.subf %14, %10 : vector<8x128xf32>
    %28 = vector.broadcast %26 : vector<8x1xf32> to vector<8x128xf32>
    %29 = arith.addf %27, %28 : vector<8x128xf32>
    %30 = arith.mulf %23, %29 : vector<8x128xf32>
    %31 = vector.shape_cast %30 : vector<8x128xf32> to vector<1x8x128xf32>
    %cst_8 = arith.constant dense<0.000000e+00> : vector<8x128xf32>
    %32 = vector.multi_reduction <add>, %31, %cst_8 [0] : vector<1x8x128xf32> to vector<8x128xf32>
    %c0_9 = arith.constant 0 : index
    %c0_10 = arith.constant 0 : index
    %c0_11 = arith.constant 0 : index
    %33 = vector.load %arg3[%c0_9, %c0_10, %c0_11] : memref<1x8x128xf32, #tpu.memory_space<vmem>>, vector<1x8x128xf32>
    %34 = vector.shape_cast %33 : vector<1x8x128xf32> to vector<8x128xf32>
    %35 = vector.shape_cast %32 : vector<8x128xf32> to vector<1x8x128xf32>
    tpu.vector_store %arg3[%c0_9, %c0_10, %c0_11], %35 {strides = array<i32>} : memref<1x8x128xf32, #tpu.memory_space<vmem>>, vector<1x8x128xf32>,
    return
  }
  func.func @transform_0(%arg0: i32) -> (i32, i32) {
    %c0_i32 = arith.constant 0 : i32
    %c0_i32_0 = arith.constant 0 : i32
    return %arg0, %c0_i32 : i32, i32
  }
  func.func @transform_1(%arg0: i32) -> (i32, i32) {
    %c0_i32 = arith.constant 0 : i32
    %c0_i32_0 = arith.constant 0 : i32
    return %arg0, %c0_i32 : i32, i32
  }
  func.func @transform_2(%arg0: i32) -> (i32, i32, i32) {
    %c0_i32 = arith.constant 0 : i32
    %c0_i32_0 = arith.constant 0 : i32
    %c0_i32_1 = arith.constant 0 : i32
    return %arg0, %c0_i32, %c0_i32_0 : i32, i32, i32
  }
}

</mosaic_0001>

<bundles_post_ra>
// kernel: tpu_custom_call.1
= control target key start
LH: loop header
LB: loop body
LE: loop exit
PB: predicated region body
PF: predicated region fallthrough
CT: control target
= control target key end

     0   :  { %7 = vsyncpa [#allocation3], 0  ;;  %s727_s0 = inlined_call_operand.hbm [shape: f32[16,128], index: 0, kind: input, shape index: {}]   ;;  %s728_s1 = inlined_call_operand.hbm [shape: f32[16,128], index: 1, kind: input, shape index: {}]   ;;  %s729_s2 = inlined_call_operand.hbm [shape: f32[2,8,128], index: 2, kind: output, shape index: {}]  }
   0x1   :  { %9 = vsyncpa [#allocation3 + $0x1], 0 }
   0x2   :  { %10 = vsyncpa [#allocation6], 0 }
   0x3   :  { %12 = vsyncpa [#allocation6 + $0x1], 0 }
   0x4   :  { %13 = vsyncpa [#allocation4], 0 }
   0x5   :  { %15 = vsyncpa [#allocation4 + $0x1], 0  ;;  %s562_s9 = smov 0   ;;  %s564_s10 = smov 0  }
   0x6   :  { %s566_s11 = smov 0   ;;  %s568_s12 = smov 0  }
   0x7 LB: > { %s583_s13 = sadd.s32 4294967295, %s545_s12   ;;  %s339_s14 = sadd.s32 4294967294, %s545_s12   ;;  %s545_s12 = sphi %s568_s12, %s740_s12   ;;  %s541_s11 = sphi %s566_s11, %s739_s11   ;;  %s537_s10 = sphi %s564_s10, %s738_s10   ;;  %s533_s9 = sphi %s562_s9, %s737_s9  }
   0x8   : > { %s587_s15 = sadd.s32 1, %s545_s12   ;;  %s28_s16 = sadd.s32 1, %s541_s11 }
   0x9   : > { %s25_s17 = ssub.s32 %s545_s12, %s587_s15  ;;  %p35_p0 = scmp.ne.s32.totalorder %s541_s11, %s537_s10 }
   0xa   : > { %p26_p1 = scmp.eq.s32.totalorder %s25_s17, 0  ;;  %p36_p2 = scmp.eq.s32.totalorder %s545_s12, 0 }
   0xb   : > { %p41_p3 = scmp.ne.s32.totalorder %s537_s10, %s533_s9  ;;  %p42_p4 = scmp.eq.s32.totalorder %s583_s13, 0 }
   0xc   : > { %s599_s18 = scalar_select %p26_p1, %s541_s11, %s28_s16  }
   0xd   : > { %p601_p5 = por %p36_p2, %p35_p0  ;;  %p605_p6 = por %p42_p4, %p41_p3 }
   0xe   : > { %p91_p7 = scmp.eq.s32.totalorder %s583_s13, 1  ;;  %p97_p8 = scmp.eq.s32.totalorder %s339_s14, 1 }
   0xf   : > { %p371_p10 = scmp.lt.s32.totalorder %s545_s12, 2  ;;  %s621_s23 = sand.u32 1, %s541_s11  }
  0x10   : > { %p612_p11 = por %p91_p7, %p35_p0  ;;  %p616_p12 = por %p97_p8, %p41_p3 }
  0x11   : > { %s343_s24 = sshll.u32 %s545_s12, 3  ;;  %s342_s25 = sshll.u32 %s621_s23, 3 }
  0x12   : > { %s125_s28 = scalar_lea.hbm %s727_s0, %s343_s24  ;;  %s121_s30 = scalar_lea.vmem [#allocation2], %s342_s25 }
  0x13   : > { %s127_s29 = sshll.u32 %s125_s28, 4  ;;  %s129_s3 = sshll.u32 %s121_s30, 4  ;;  %s128_s29 = int_to_ptr.hbm [resolvable:$true] %s127_s29  ;;  %s130_s3 = int_to_ptr.vmem [resolvable:$true] %s129_s3 }
  0x14   : > { %p630_p13 = pnand %p371_p10, %p601_p5  ;;  %p346_p0 = scmp.ge.s32.totalorder %s545_s12, 1 }
  0x15   : > { %p153_p1 = scmp.lt.s32.totalorder %s545_s12, 3  ;;  %s118_s5 = scalar_lea.sflag [#allocation3], %s621_s23 }
  0x16   : > { %s415_s6 = sshra.s32 %s128_s29, 4  ;;  %p419_p3 = pneg %p630_p13  ;;  %s416_s6 = int_to_ptr.hbm [resolvable:$true] %s415_s6 }
  0x17   : > { %s417_s7 = scalar_lea.hbm %s416_s6, 8  ;;  %s422_s16 = scalar_lea.hbm %s727_s0, 16 }
  0x18   : > { %p418_p2 = scmp.ne.s32.totalorder %s416_s6, %s417_s7  ;;  %p423_p5 = scmp.lt.s32.totalorder %s416_s6, %s727_s0 }
  0x19   : > { %p424_p8 = scmp.lt.s32.totalorder %s422_s16, %s417_s7 }
  0x1a   : > { %p420_p4 = pnand %p419_p3, %p418_p2 }
  0x1b   : > { %p425_p10 = por %p424_p8, %p423_p5 }
  0x1c   : > { %p421_p7 = pneg %p420_p4 }
  0x1e   : > { %p426_p9 = pnand %p425_p10, %p421_p7 }
  0x20   : > { %429 = shalt.err (!%p426_p9)
}
  0x21   : > { %363 = dma.hbm_to_vmem [thread:$0]  (!%p630_p13), %s128_s29, 128, %s130_s3, %s118_s5  }
  0x22   : > { %p654_p2 = pnand %p346_p0, %p153_p1  ;;  %s144_s30 = scalar_lea.hbm %s728_s1, %s343_s24 }
  0x23   : > { %s146_s6 = sshll.u32 %s144_s30, 4  ;;  %s140_s7 = scalar_lea.vmem [#allocation5], %s342_s25  ;;  %s147_s6 = int_to_ptr.hbm [resolvable:$true] %s146_s6 }
  0x24   : > { %s148_s8 = sshll.u32 %s140_s7, 4  ;;  %s137_s14 = scalar_lea.sflag [#allocation6], %s621_s23  ;;  %s149_s8 = int_to_ptr.vmem [resolvable:$true] %s148_s8 }
  0x25   : > { %s445_s16 = sshra.s32 %s147_s6, 4  ;;  %s452_s5 = scalar_lea.hbm %s728_s1, 16  ;;  %s446_s16 = int_to_ptr.hbm [resolvable:$true] %s445_s16 }
  0x26   : > { %s447_s17 = scalar_lea.hbm %s446_s16, 8  ;;  %p453_p4 = scmp.lt.s32.totalorder %s446_s16, %s728_s1 }
  0x27   : > { %p448_p9 = scmp.ne.s32.totalorder %s446_s16, %s447_s17  ;;  %p454_p7 = scmp.lt.s32.totalorder %s452_s5, %s447_s17 }
  0x29   : > { %p450_p0 = pnand %p448_p9, %p419_p3  ;;  %p455_p5 = por %p454_p7, %p453_p4 }
  0x2b   : > { %p451_p1 = pneg %p450_p0 }
  0x2d   : > { %p456_p8 = pnand %p455_p5, %p451_p1 }
  0x2f   : > { %459 = shalt.err (!%p456_p8)
}
  0x30   : > { %366 = dma.hbm_to_vmem [thread:$0]  (!%p630_p13), %s147_s6, 128, %s149_s8, %s137_s14  }
  0x31   : > { %157 = sbr.rel (%p654_p2) target bundleno = 324 (0x144), region = 28  ;;  %s676_s23 = sand.u32 (!%p654_p2), 1, %s537_s10  }
  0x32   : > { %s679_s25 = sshll.u32 (!%p654_p2), %s676_s23, 3  ;;  %s160_s27 = scalar_lea.sflag (!%p654_p2), [#allocation3], %s676_s23 }
  0x33   : > { %s163_s28 = scalar_lea.vmem (!%p654_p2), [#allocation2], %s679_s25 }
  0x36   : > { %520 = dma.done.wait (%p605_p6), %s160_s27, 128  }
  0x37   : > { %522 = vsyncadd (%p605_p6), %s160_s27, 4294967168  ;;  %s170_s4 = scalar_lea.sflag [#allocation6], %s676_s23  ;;  %s173_s26 = scalar_lea.vmem [#allocation5], %s679_s25 }
  0x38   : > { %524 = dma.done.wait (%p605_p6), %s170_s4, 128  }
  0x39   : > { %526 = vsyncadd (%p605_p6), %s170_s4, 4294967168  ;;  %v200_v0 = vld [vmem:[%s163_s28] sm:$0xff]  ;;  %v201_v1 = vld [vmem:[%s173_s26] sm:$0xff]  ;;  %s351_s20 = sshll.u32 %s583_s13, 3  ;;  %s199_s8 = scalar_lea.vmem [#allocation7], %s679_s25 }
  0x3a   : > { %v202_v2 = vmax.f32 %v200_v0, %v201_v1  ;;  %v206_v3 = vmul.f32 0.8333333, %v200_v0  ;;  %v208_v4 = vmul.f32 0.8333333, %v201_v1  ;;  %s241_s7 = scalar_lea.hbm %s729_s2, %s351_s20  ;;  %s243_s14 = sshll.u32 %s199_s8, 4  ;;  %s244_s14 = int_to_ptr.vmem [resolvable:$true] %s243_s14 }
  0x3b   : > { %s245_s16 = sshll.u32 %s241_s7, 4  ;;  %s231_s13 = scalar_lea.sflag [#allocation4], %s676_s23  ;;  %s246_s16 = int_to_ptr.hbm [resolvable:$true] %s245_s16 }
  0x3c   : > { %203 = vmax.xlane.f32.xlu0 %v202_v2  ;;  %s489_s17 = sshra.s32 %s246_s16, 4  ;;  %s495_s19 = scalar_lea.hbm %s729_s2, 16  ;;  %s490_s17 = int_to_ptr.hbm [resolvable:$true] %s489_s17 }
  0x3d   : > { %s491_s29 = scalar_lea.hbm %s490_s17, 8  ;;  %p496_p10 = scmp.lt.s32.totalorder %s490_s17, %s729_s2 }
  0x3e   : > { %p492_p6 = scmp.ne.s32.totalorder %s490_s17, %s491_s29  ;;  %p497_p2 = scmp.lt.s32.totalorder %s495_s19, %s491_s29 }
  0x40   : > { %p493_p13 = pnand %p492_p6, %p612_p11  ;;  %p498_p9 = por %p497_p2, %p496_p10 }
  0x42   : > { %p494_p3 = pneg %p493_p13 }
  0x44   : > { %p499_p0 = pnand %p498_p9, %p494_p3 }
  0xaf   : > { %v204_v5 = vpop.xlane.xlu0 %203 }
  0xb0   : > { %v205_v6 = vmul.f32 0.8333333, %v204_v5 }
  0xb2   : > { %v207_v7 = vsub.f32 %v206_v3, %v205_v6  ;;  %v209_v8 = vsub.f32 %v208_v4, %v205_v6 }
  0xb4   : > { %v210_v9 = vmul.f32 1.442695, %v207_v7  ;;  %v214_v10 = vmul.f32 1.442695, %v209_v8  ;;  %v225_v11 = vsub.f32 %v209_v8, %v207_v7 }
  0xb6   : > { %405 = vpow2.f32 %v210_v9 }
  0xb7   : > { %407 = vpow2.f32 %v214_v10 }
  0xbc   : > { %v406_v12 = vpop.eup %405 }
  0xbd   : > { %v408_v13 = vpop.eup %407  ;;  %212 = vadd.xlane.f32.xlu0 %v406_v12 }
  0xbe   : > { %216 = vadd.xlane.f32.xlu1 %v408_v13 }
 0x130   : > { %v213_v14 = vpop.xlane.xlu0 %212 }
 0x131   : > { %v217_v15 = vpop.xlane.xlu1 %216  ;;  %409 = vlog2.f32 %v213_v14 }
 0x132   : > { %411 = vlog2.f32 %v217_v15 }
 0x133   : > { %413 = vrcp.f32 %v217_v15 }
 0x137   : > { %v410_v16 = vpop.eup %409 }
 0x138   : > { %v221_v17 = vmul.f32 0.6931472, %v410_v16  ;;  %v412_v18 = vpop.eup %411 }
 0x139   : > { %v223_v19 = vmul.f32 0.6931472, %v412_v18  ;;  %v414_v20 = vpop.eup %413 }
 0x13a   : > { %v219_v22 = vmul.f32 %v414_v20, %v408_v13 }
 0x13b   : > { %v224_v21 = vsub.f32 %v221_v17, %v223_v19 }
 0x13d   : > { %v226_v23 = vadd.f32 %v225_v11, %v224_v21 }
 0x13f   : > { %v227_v24 = vmul.f32 %v226_v23, %v219_v22 }
 0x141   : > { %229 = vst [vmem:[%s199_s8] sm:$0xff] %v227_v24 }
 0x142   : > { %502 = shalt.err (!%p499_p0)
}
 0x143   : > { %358 = dma.vmem_to_hbm [thread:$0]  (%p612_p11), %s244_s14, 128, %s246_s16, %s231_s13  }
 0x144 PF: > { %s257_s23 = sand.u32 1, %s533_s9   ;;  %p736_p1 = scmp.ge.s32.totalorder %s545_s12, 2 }
 0x145   : > { %s258_s27 = scalar_lea.sflag [#allocation4], %s257_s23 }
 0x146   : > { %p368_p4 = pnand %p736_p1, %p616_p12 }
 0x148   : > { %p369_p7 = pneg %p368_p4 }
 0x14a   : > { %528 = dma.done.wait (%p369_p7), %s258_s27, 128  }
 0x14b   : > { %530 = vsyncadd (%p369_p7), %s258_s27, 4294967168  ;;  %p18_p5 = scmp.ge.s32.totalorder %s587_s15, 4   ;;  %s737_s9 = smov %s537_s10 }
 0x14c   : > { %s738_s10 = smov %s541_s11  ;;  %s739_s11 = smov %s599_s18 }
 0x14d   : > { %s740_s12 = smov %s587_s15  ;;  %20 = sbr.rel (!%p18_p5) target bundleno = 7 (0x7), region = 86 }
 0x152   :  { %264 = vsyncpa [#allocation3], 1 }
 0x153   :  { %266 = vsyncpa [#allocation3 + $0x1], 1 }
 0x154   :  { %267 = vsyncpa [#allocation6], 1 }
 0x155   :  { %269 = vsyncpa [#allocation6 + $0x1], 1 }
 0x156   :  { %270 = vsyncpa [#allocation4], 1 }
 0x157   :  { %272 = vsyncpa [#allocation4 + $0x1], 1 }

</bundles_post_ra>
